<compile_context>
chip_gen: v6e
topology: v6e:2x2x1
jax: 0.10.0
libtpu: 0.0.40
codegen_flags: <defaults>
</compile_context>

<pallas_src>
import functools

import jax
import jax.numpy as jnp
from jax.experimental import pallas as pl
from jax.experimental.pallas import tpu as pltpu

W1 = 512          # matches `w1 = 512` in the reference module
_LANE = 128       # TPU lane width
_MAX_BLOCK_B = 2048   # VMEM-safe batch-tile cap (sized for v7x 64 MiB / 32 MiB scoped)


def _round_up(n, m):
    return ((n + m - 1) // m) * m


def _pad2d(a, target_shape):
    pads = [(0, t - s) for s, t in zip(a.shape, target_shape)]
    if any(p for _, p in pads):
        a = jnp.pad(a, pads)
    return a


def _mlp_kernel(x_ref,
                w1_ref, b1_ref, w2_ref, b2_ref, w3_ref, b3_ref,
                w4_ref, b4_ref, w5_ref, b5_ref, w6_ref, b6_ref,
                o_ref):
    """Whole 6-layer MLP on one batch tile; weights resident in VMEM."""

    def layer(h, w_ref, b_ref, relu):
        # bf16 (or f32) operands, f32 accumulation on the MXU.
        acc = jnp.dot(h.astype(w_ref.dtype), w_ref[...],
                      preferred_element_type=jnp.float32)
        acc = acc + b_ref[...]          # bias-add in f32 (cheap VPU op on all gens)
        return jnp.maximum(acc, 0.0) if relu else acc

    h = x_ref[...]
    h = layer(h, w1_ref, b1_ref, True)
    h = layer(h, w2_ref, b2_ref, True)
    h = layer(h, w3_ref, b3_ref, True)
    h = layer(h, w4_ref, b4_ref, True)
    h = layer(h, w5_ref, b5_ref, True)
    h = layer(h, w6_ref, b6_ref, False)
    o_ref[...] = h.astype(o_ref.dtype)


def init_params(key, input_dim, bottle_dim, dtype=jnp.float32):
    """Deterministic init. Weights are [in, out] (transposed vs torch), biases [1, out]."""
    dims = [input_dim, W1, W1 // 2, bottle_dim, W1 // 2, W1, input_dim]
    params = []
    for i in range(6):
        fan_in, fan_out = dims[i], dims[i + 1]
        key, kw, kb = jax.random.split(key, 3)
        bound = 1.0 / (fan_in ** 0.5)
        w = jax.random.uniform(kw, (fan_in, fan_out), dtype, -bound, bound)
        b = jax.random.uniform(kb, (1, fan_out), dtype, -bound, bound)
        params.append((w, b))
    return params


@functools.partial(jax.jit, static_argnames=("block_b", "compute_dtype"))
def neural_network4_forward(x, params, block_b=256, compute_dtype=jnp.bfloat16):
    """Pallas forward pass. x: [batch, input_dim]. Returns (y, zeros(1))."""
    batch, input_dim = x.shape

    in_dims = [w.shape[0] for w, _ in params]
    out_dims = [w.shape[1] for w, _ in params]
    assert in_dims[0] == input_dim and out_dims[-1] == input_dim
    p_in = [_round_up(d, _LANE) for d in in_dims]    # lane-dense padded dims
    p_out = [_round_up(d, _LANE) for d in out_dims]
    d_pad = p_in[0]

    # ---- batch tile selection --------------------------------------------
    b16 = _round_up(batch, 16)                       # bf16 sublane packing = 16
    bb = min(_round_up(block_b, 16), b16, _MAX_BLOCK_B)
    if b16 > 16 and b16 <= bb:
        # Split into >= 2 grid steps so both v7x TensorCores get work.
        bb = _round_up((b16 + 1) // 2, 16)
    b_pad = _round_up(batch, bb)
    grid = (b_pad // bb,)

    # ---- pad + cast operands (zero padding is exact; see header) ----------
    x_p = _pad2d(x.astype(jnp.float32), (b_pad, d_pad)).astype(compute_dtype)
    flat = []
    for i, (w, b) in enumerate(params):
        flat.append(_pad2d(w, (p_in[i], p_out[i])).astype(compute_dtype))
        flat.append(_pad2d(b.reshape(1, -1).astype(jnp.float32), (1, p_out[i])))

    # ---- specs -------------------------------------------------------------
    in_specs = [pl.BlockSpec((bb, d_pad), lambda i: (i, 0))]
    for a in flat:
        # Full array, same block for every grid step -> resident in VMEM; the
        # pipeline skips re-issuing DMAs for blocks whose index is unchanged.
        in_specs.append(pl.BlockSpec(a.shape, lambda i, n=a.ndim: (0,) * n))
    out_specs = pl.BlockSpec((bb, d_pad), lambda i: (i, 0))

    flops = 2 * b_pad * sum(pi * po for pi, po in zip(p_in, p_out))
    bytes_accessed = (x_p.size * x_p.dtype.itemsize
                      + b_pad * d_pad * jnp.dtype(x.dtype).itemsize
                      + sum(a.size * a.dtype.itemsize for a in flat))

    y_pad = pl.pallas_call(
        _mlp_kernel,
        out_shape=jax.ShapeDtypeStruct((b_pad, d_pad), x.dtype),
        grid_spec=pltpu.PrefetchScalarGridSpec(
            num_scalar_prefetch=0,
            grid=grid,
            in_specs=in_specs,
            out_specs=out_specs,
        ),
        compiler_params=pltpu.CompilerParams(
            dimension_semantics=("parallel",),
            vmem_limit_bytes=32 * 1024 * 1024,
        ),
        cost_estimate=pl.CostEstimate(
            flops=flops, transcendentals=0, bytes_accessed=bytes_accessed),
    )(x_p, *flat)

    y = y_pad[:batch, :input_dim]
    # Second output of the torch module is a constant zeros(1); plain JAX glue.
    return y, jnp.zeros((1,), dtype=x.dtype)


def _reference_forward(x, params, compute_dtype=jnp.float32):
    """Pure-JAX reference mirroring the kernel's dtype strategy."""
    h = x.astype(jnp.float32)
    n = len(params)
    for i, (w, b) in enumerate(params):
        h = jnp.dot(h.astype(compute_dtype), w.astype(compute_dtype),
                    preferred_element_type=jnp.float32)
        h = h + b.reshape(1, -1).astype(jnp.float32)
        if i < n - 1:
            h = jnp.maximum(h, 0.0)
    return h.astype(x.dtype)


if __name__ == "__main__":
    key = jax.random.PRNGKey(0)
    key, kx, kp = jax.random.split(key, 3)

    batch = 8
    input_dim = 64
    bottle_dim = 32

    x = jax.random.normal(kx, (batch, input_dim), jnp.float32)
    params = init_params(kp, input_dim, bottle_dim)

    y, aux = neural_network4_forward(x, params)
    jax.block_until_ready((y, aux))

    assert y.shape == (batch, input_dim)
    assert aux.shape == (1,)
    assert bool(jnp.all(aux == 0))

    # Tight check vs a reference that mirrors the kernel's bf16-operand /
    # f32-accumulate strategy.
    y_bf16_ref = _reference_forward(x, params, compute_dtype=jnp.bfloat16)
    assert jnp.allclose(y, y_bf16_ref, atol=5e-3, rtol=5e-3), "mismatch vs bf16 reference"

    # Loose sanity check vs the plain f32 reference (bf16 operands introduce
    # ~0.5-2% error through 6 layers).
    y_f32_ref = _reference_forward(x, params, compute_dtype=jnp.float32)
    assert jnp.allclose(y, y_f32_ref, atol=0.3, rtol=0.1), "mismatch vs f32 reference"

    print("KERNEL_OK")
</pallas_src>

<mosaic_0001>
module attributes {stable_mosaic.version = 11 : i64} {
  func.func @_mlp_kernel(%arg0: i32, %arg1: memref<16x128xbf16, #tpu.memory_space<vmem>>, %arg2: memref<128x512xbf16, #tpu.memory_space<vmem>>, %arg3: memref<1x512xf32, #tpu.memory_space<vmem>>, %arg4: memref<512x256xbf16, #tpu.memory_space<vmem>>, %arg5: memref<1x256xf32, #tpu.memory_space<vmem>>, %arg6: memref<256x128xbf16, #tpu.memory_space<vmem>>, %arg7: memref<1x128xf32, #tpu.memory_space<vmem>>, %arg8: memref<128x256xbf16, #tpu.memory_space<vmem>>, %arg9: memref<1x256xf32, #tpu.memory_space<vmem>>, %arg10: memref<256x512xbf16, #tpu.memory_space<vmem>>, %arg11: memref<1x512xf32, #tpu.memory_space<vmem>>, %arg12: memref<512x128xbf16, #tpu.memory_space<vmem>>, %arg13: memref<1x128xf32, #tpu.memory_space<vmem>>, %arg14: memref<16x128xf32, #tpu.memory_space<vmem>>) attributes {dimension_semantics = [#tpu.dimension_semantics<parallel>], iteration_bounds = array<i64: 1>, scalar_prefetch = 0 : i64, scratch_operands = 0 : i64, tpu.core_type = #tpu.core_type<tc>, window_params = [{transform_indices = @transform_0, window_bounds = array<i64: 16, 128>}, {pipeline_mode = #tpu.pipeline_mode<synchronous>, transform_indices = @transform_1, window_bounds = array<i64: 128, 512>}, {pipeline_mode = #tpu.pipeline_mode<synchronous>, transform_indices = @transform_2, window_bounds = array<i64: 1, 512>}, {pipeline_mode = #tpu.pipeline_mode<synchronous>, transform_indices = @transform_3, window_bounds = array<i64: 512, 256>}, {pipeline_mode = #tpu.pipeline_mode<synchronous>, transform_indices = @transform_4, window_bounds = array<i64: 1, 256>}, {pipeline_mode = #tpu.pipeline_mode<synchronous>, transform_indices = @transform_5, window_bounds = array<i64: 256, 128>}, {pipeline_mode = #tpu.pipeline_mode<synchronous>, transform_indices = @transform_6, window_bounds = array<i64: 1, 128>}, {pipeline_mode = #tpu.pipeline_mode<synchronous>, transform_indices = @transform_7, window_bounds = array<i64: 128, 256>}, {pipeline_mode = #tpu.pipeline_mode<synchronous>, transform_indices = @transform_8, window_bounds = array<i64: 1, 256>}, {pipeline_mode = #tpu.pipeline_mode<synchronous>, transform_indices = @transform_9, window_bounds = array<i64: 256, 512>}, {pipeline_mode = #tpu.pipeline_mode<synchronous>, transform_indices = @transform_10, window_bounds = array<i64: 1, 512>}, {pipeline_mode = #tpu.pipeline_mode<synchronous>, transform_indices = @transform_11, window_bounds = array<i64: 512, 128>}, {pipeline_mode = #tpu.pipeline_mode<synchronous>, transform_indices = @transform_12, window_bounds = array<i64: 1, 128>}, {transform_indices = @transform_13, window_bounds = array<i64: 16, 128>}]} {
    %c0 = arith.constant 0 : index
    %c0_0 = arith.constant 0 : index
    %0 = vector.load %arg1[%c0, %c0_0] : memref<16x128xbf16, #tpu.memory_space<vmem>>, vector<16x128xbf16>
    %c0_1 = arith.constant 0 : index
    %c0_2 = arith.constant 0 : index
    %1 = vector.load %arg2[%c0_1, %c0_2] : memref<128x512xbf16, #tpu.memory_space<vmem>>, vector<128x512xbf16>
    %cst = arith.constant dense<0.000000e+00> : vector<16x512xf32>
    %2 = tpu.matmul %0, %1, %cst {dimension_numbers = #tpu.dot_dimension_numbers<[1], [0], [0], [1], [0, 0, 1, 1], [], []>} : vector<16x128xbf16>, vector<128x512xbf16>, vector<16x512xf32> -> vector<16x512xf32>
    %c0_3 = arith.constant 0 : index
    %c0_4 = arith.constant 0 : index
    %3 = vector.load %arg3[%c0_3, %c0_4] : memref<1x512xf32, #tpu.memory_space<vmem>>, vector<1x512xf32>
    %4 = vector.broadcast %3 : vector<1x512xf32> to vector<16x512xf32>
    %5 = arith.addf %2, %4 : vector<16x512xf32>
    %cst_5 = arith.constant 0.000000e+00 : f32
    %6 = vector.broadcast %cst_5 : f32 to vector<16x512xf32>
    %7 = arith.maximumf %5, %6 : vector<16x512xf32>
    %8 = arith.truncf %7 : vector<16x512xf32> to vector<16x512xbf16>
    %c0_6 = arith.constant 0 : index
    %c0_7 = arith.constant 0 : index
    %9 = vector.load %arg4[%c0_6, %c0_7] : memref<512x256xbf16, #tpu.memory_space<vmem>>, vector<512x256xbf16>
    %cst_8 = arith.constant dense<0.000000e+00> : vector<16x256xf32>
    %10 = tpu.matmul %8, %9, %cst_8 {dimension_numbers = #tpu.dot_dimension_numbers<[1], [0], [0], [1], [0, 0, 1, 1], [], []>} : vector<16x512xbf16>, vector<512x256xbf16>, vector<16x256xf32> -> vector<16x256xf32>
    %c0_9 = arith.constant 0 : index
    %c0_10 = arith.constant 0 : index
    %11 = vector.load %arg5[%c0_9, %c0_10] : memref<1x256xf32, #tpu.memory_space<vmem>>, vector<1x256xf32>
    %12 = vector.broadcast %11 : vector<1x256xf32> to vector<16x256xf32>
    %13 = arith.addf %10, %12 : vector<16x256xf32>
    %cst_11 = arith.constant 0.000000e+00 : f32
    %14 = vector.broadcast %cst_11 : f32 to vector<16x256xf32>
    %15 = arith.maximumf %13, %14 : vector<16x256xf32>
    %16 = arith.truncf %15 : vector<16x256xf32> to vector<16x256xbf16>
    %c0_12 = arith.constant 0 : index
    %c0_13 = arith.constant 0 : index
    %17 = vector.load %arg6[%c0_12, %c0_13] : memref<256x128xbf16, #tpu.memory_space<vmem>>, vector<256x128xbf16>
    %cst_14 = arith.constant dense<0.000000e+00> : vector<16x128xf32>
    %18 = tpu.matmul %16, %17, %cst_14 {dimension_numbers = #tpu.dot_dimension_numbers<[1], [0], [0], [1], [0, 0, 1, 1], [], []>} : vector<16x256xbf16>, vector<256x128xbf16>, vector<16x128xf32> -> vector<16x128xf32>
    %c0_15 = arith.constant 0 : index
    %c0_16 = arith.constant 0 : index
    %19 = vector.load %arg7[%c0_15, %c0_16] : memref<1x128xf32, #tpu.memory_space<vmem>>, vector<1x128xf32>
    %20 = vector.broadcast %19 : vector<1x128xf32> to vector<16x128xf32>
    %21 = arith.addf %18, %20 : vector<16x128xf32>
    %cst_17 = arith.constant 0.000000e+00 : f32
    %22 = vector.broadcast %cst_17 : f32 to vector<16x128xf32>
    %23 = arith.maximumf %21, %22 : vector<16x128xf32>
    %24 = arith.truncf %23 : vector<16x128xf32> to vector<16x128xbf16>
    %c0_18 = arith.constant 0 : index
    %c0_19 = arith.constant 0 : index
    %25 = vector.load %arg8[%c0_18, %c0_19] : memref<128x256xbf16, #tpu.memory_space<vmem>>, vector<128x256xbf16>
    %cst_20 = arith.constant dense<0.000000e+00> : vector<16x256xf32>
    %26 = tpu.matmul %24, %25, %cst_20 {dimension_numbers = #tpu.dot_dimension_numbers<[1], [0], [0], [1], [0, 0, 1, 1], [], []>} : vector<16x128xbf16>, vector<128x256xbf16>, vector<16x256xf32> -> vector<16x256xf32>
    %c0_21 = arith.constant 0 : index
    %c0_22 = arith.constant 0 : index
    %27 = vector.load %arg9[%c0_21, %c0_22] : memref<1x256xf32, #tpu.memory_space<vmem>>, vector<1x256xf32>
    %28 = vector.broadcast %27 : vector<1x256xf32> to vector<16x256xf32>
    %29 = arith.addf %26, %28 : vector<16x256xf32>
    %cst_23 = arith.constant 0.000000e+00 : f32
    %30 = vector.broadcast %cst_23 : f32 to vector<16x256xf32>
    %31 = arith.maximumf %29, %30 : vector<16x256xf32>
    %32 = arith.truncf %31 : vector<16x256xf32> to vector<16x256xbf16>
    %c0_24 = arith.constant 0 : index
    %c0_25 = arith.constant 0 : index
    %33 = vector.load %arg10[%c0_24, %c0_25] : memref<256x512xbf16, #tpu.memory_space<vmem>>, vector<256x512xbf16>
    %cst_26 = arith.constant dense<0.000000e+00> : vector<16x512xf32>
    %34 = tpu.matmul %32, %33, %cst_26 {dimension_numbers = #tpu.dot_dimension_numbers<[1], [0], [0], [1], [0, 0, 1, 1], [], []>} : vector<16x256xbf16>, vector<256x512xbf16>, vector<16x512xf32> -> vector<16x512xf32>
    %c0_27 = arith.constant 0 : index
    %c0_28 = arith.constant 0 : index
    %35 = vector.load %arg11[%c0_27, %c0_28] : memref<1x512xf32, #tpu.memory_space<vmem>>, vector<1x512xf32>
    %36 = vector.broadcast %35 : vector<1x512xf32> to vector<16x512xf32>
    %37 = arith.addf %34, %36 : vector<16x512xf32>
    %cst_29 = arith.constant 0.000000e+00 : f32
    %38 = vector.broadcast %cst_29 : f32 to vector<16x512xf32>
    %39 = arith.maximumf %37, %38 : vector<16x512xf32>
    %40 = arith.truncf %39 : vector<16x512xf32> to vector<16x512xbf16>
    %c0_30 = arith.constant 0 : index
    %c0_31 = arith.constant 0 : index
    %41 = vector.load %arg12[%c0_30, %c0_31] : memref<512x128xbf16, #tpu.memory_space<vmem>>, vector<512x128xbf16>
    %cst_32 = arith.constant dense<0.000000e+00> : vector<16x128xf32>
    %42 = tpu.matmul %40, %41, %cst_32 {dimension_numbers = #tpu.dot_dimension_numbers<[1], [0], [0], [1], [0, 0, 1, 1], [], []>} : vector<16x512xbf16>, vector<512x128xbf16>, vector<16x128xf32> -> vector<16x128xf32>
    %c0_33 = arith.constant 0 : index
    %c0_34 = arith.constant 0 : index
    %43 = vector.load %arg13[%c0_33, %c0_34] : memref<1x128xf32, #tpu.memory_space<vmem>>, vector<1x128xf32>
    %44 = vector.broadcast %43 : vector<1x128xf32> to vector<16x128xf32>
    %45 = arith.addf %42, %44 : vector<16x128xf32>
    %c0_35 = arith.constant 0 : index
    %c0_36 = arith.constant 0 : index
    %46 = vector.load %arg14[%c0_35, %c0_36] : memref<16x128xf32, #tpu.memory_space<vmem>>, vector<16x128xf32>
    tpu.vector_store %arg14[%c0_35, %c0_36], %45 {strides = array<i32>} : memref<16x128xf32, #tpu.memory_space<vmem>>, vector<16x128xf32>,
    return
  }
  func.func @transform_0(%arg0: i32) -> (i32, i32) {
    %c0_i32 = arith.constant 0 : i32
    %c0_i32_0 = arith.constant 0 : i32
    return %arg0, %c0_i32 : i32, i32
  }
  func.func @transform_1(%arg0: i32) -> (i32, i32) {
    %c0_i32 = arith.constant 0 : i32
    %c0_i32_0 = arith.constant 0 : i32
    %c0_i32_1 = arith.constant 0 : i32
    return %c0_i32, %c0_i32_0 : i32, i32
  }
  func.func @transform_2(%arg0: i32) -> (i32, i32) {
    %c0_i32 = arith.constant 0 : i32
    %c0_i32_0 = arith.constant 0 : i32
    %c0_i32_1 = arith.constant 0 : i32
    return %c0_i32, %c0_i32_0 : i32, i32
  }
  func.func @transform_3(%arg0: i32) -> (i32, i32) {
    %c0_i32 = arith.constant 0 : i32
    %c0_i32_0 = arith.constant 0 : i32
    %c0_i32_1 = arith.constant 0 : i32
    return %c0_i32, %c0_i32_0 : i32, i32
  }
  func.func @transform_4(%arg0: i32) -> (i32, i32) {
    %c0_i32 = arith.constant 0 : i32
    %c0_i32_0 = arith.constant 0 : i32
    %c0_i32_1 = arith.constant 0 : i32
    return %c0_i32, %c0_i32_0 : i32, i32
  }
  func.func @transform_5(%arg0: i32) -> (i32, i32) {
    %c0_i32 = arith.constant 0 : i32
    %c0_i32_0 = arith.constant 0 : i32
    %c0_i32_1 = arith.constant 0 : i32
    return %c0_i32, %c0_i32_0 : i32, i32
  }
  func.func @transform_6(%arg0: i32) -> (i32, i32) {
    %c0_i32 = arith.constant 0 : i32
    %c0_i32_0 = arith.constant 0 : i32
    %c0_i32_1 = arith.constant 0 : i32
    return %c0_i32, %c0_i32_0 : i32, i32
  }
  func.func @transform_7(%arg0: i32) -> (i32, i32) {
    %c0_i32 = arith.constant 0 : i32
    %c0_i32_0 = arith.constant 0 : i32
    %c0_i32_1 = arith.constant 0 : i32
    return %c0_i32, %c0_i32_0 : i32, i32
  }
  func.func @transform_8(%arg0: i32) -> (i32, i32) {
    %c0_i32 = arith.constant 0 : i32
    %c0_i32_0 = arith.constant 0 : i32
    %c0_i32_1 = arith.constant 0 : i32
    return %c0_i32, %c0_i32_0 : i32, i32
  }
  func.func @transform_9(%arg0: i32) -> (i32, i32) {
    %c0_i32 = arith.constant 0 : i32
    %c0_i32_0 = arith.constant 0 : i32
    %c0_i32_1 = arith.constant 0 : i32
    return %c0_i32, %c0_i32_0 : i32, i32
  }
  func.func @transform_10(%arg0: i32) -> (i32, i32) {
    %c0_i32 = arith.constant 0 : i32
    %c0_i32_0 = arith.constant 0 : i32
    %c0_i32_1 = arith.constant 0 : i32
    return %c0_i32, %c0_i32_0 : i32, i32
  }
  func.func @transform_11(%arg0: i32) -> (i32, i32) {
    %c0_i32 = arith.constant 0 : i32
    %c0_i32_0 = arith.constant 0 : i32
    %c0_i32_1 = arith.constant 0 : i32
    return %c0_i32, %c0_i32_0 : i32, i32
  }
  func.func @transform_12(%arg0: i32) -> (i32, i32) {
    %c0_i32 = arith.constant 0 : i32
    %c0_i32_0 = arith.constant 0 : i32
    %c0_i32_1 = arith.constant 0 : i32
    return %c0_i32, %c0_i32_0 : i32, i32
  }
  func.func @transform_13(%arg0: i32) -> (i32, i32) {
    %c0_i32 = arith.constant 0 : i32
    %c0_i32_0 = arith.constant 0 : i32
    return %arg0, %c0_i32 : i32, i32
  }
}

</mosaic_0001>

<bundles_post_ra>
// kernel: neural_network4_forward.1
= control target key start
LH: loop header
LB: loop body
LE: loop exit
PB: predicated region body
PF: predicated region fallthrough
CT: control target
= control target key end

     0   :  { %v2651_v1 = vmov 0   ;;  %s3450_s1 = inlined_call_operand.vmem [shape: bf16[128,512], index: 1, kind: input, shape index: {}]   ;;  %s3451_s0 = inlined_call_operand.vmem [shape: bf16[16,128], index: 0, kind: input, shape index: {}]   ;;  %s3452_s3 = inlined_call_operand.vmem [shape: bf16[512,256], index: 3, kind: input, shape index: {}]   ;;  %s3453_s5 = inlined_call_operand.vmem [shape: bf16[256,128], index: 5, kind: input, shape index: {}]   ;;  %s3454_s2 = inlined_call_operand.vmem [shape: f32[1,512], index: 2, kind: input, shape index: {}]   ;;  %s3455_s7 = inlined_call_operand.vmem [shape: bf16[128,256], index: 7, kind: input, shape index: {}]   ;;  %s3456_s4 = inlined_call_operand.vmem [shape: f32[1,256], index: 4, kind: input, shape index: {}]   ;;  %s3457_s9 = inlined_call_operand.vmem [shape: bf16[256,512], index: 9, kind: input, shape index: {}]   ;;  %s3458_s6 = inlined_call_operand.vmem [shape: f32[1,128], index: 6, kind: input, shape index: {}]   ;;  %s3459_s11 = inlined_call_operand.vmem [shape: bf16[512,128], index: 11, kind: input, shape index: {}]   ;;  %s3460_s8 = inlined_call_operand.vmem [shape: f32[1,256], index: 8, kind: input, shape index: {}]   ;;  %s3461_s10 = inlined_call_operand.vmem [shape: f32[1,512], index: 10, kind: input, shape index: {}]   ;;  %s3462_s12 = inlined_call_operand.vmem [shape: f32[1,128], index: 12, kind: input, shape index: {}]   ;;  %s3463_s13 = inlined_call_operand.vmem [shape: f32[16,128], index: 13, kind: output, shape index: {}]  }
   0x1   :  { %v2338_v0 = vld [vmem:[%s3450_s1 + $0xe4] ss:$16 sps:$4 sm:$0xff]   ;;  %299 = vmatprep.mubr.bf16.mxu0 %v2651_v1  ;;  %342 = vmatprep.mubr.bf16.mxu1 %v2651_v1  ;;  %v2340_v2 = vld [vmem:[%s3450_s1 + $0xec] ss:$16 sps:$4 sm:$0xff]   ;;  %v2342_v3 = vld [vmem:[%s3450_s1 + $0xe0] ss:$16 sps:$4 sm:$0xff]  }
   0x2   :  { %267 = vmatprep.subr.bf16.mxu0 %v2338_v0  ;;  %v2343_v4 = vld [vmem:[%s3450_s1 + $0xe8] ss:$16 sps:$4 sm:$0xff]   ;;  %310 = vmatprep.subr.bf16.mxu1 %v2340_v2  ;;  %v2344_v5 = vld [vmem:[%s3450_s1 + $0xc4] ss:$16 sps:$4 sm:$0xff]   ;;  %v2346_v6 = vld [vmem:[%s3450_s1 + $0xcc] ss:$16 sps:$4 sm:$0xff]  }
   0x3   :  { %268 = vmatpush1.bf16.msra.mxu0 %v2342_v3  ;;  %311 = vmatpush1.bf16.msra.mxu1 %v2343_v4  ;;  %v2348_v7 = vld [vmem:[%s3450_s1 + $0xc0] ss:$16 sps:$4 sm:$0xff]   ;;  %v2349_v8 = vld [vmem:[%s3450_s1 + $0xc8] ss:$16 sps:$4 sm:$0xff]   ;;  %v2350_v9 = vld [vmem:[%s3450_s1 + $0xa4] ss:$16 sps:$4 sm:$0xff]  }
   0x4   :  { %269 = vmatprep.subr.bf16.mxu0 %v2344_v5  ;;  %312 = vmatprep.subr.bf16.mxu1 %v2346_v6  ;;  %v2352_v10 = vld [vmem:[%s3450_s1 + $0xac] ss:$16 sps:$4 sm:$0xff]   ;;  %v2354_v11 = vld [vmem:[%s3450_s1 + $0xa0] ss:$16 sps:$4 sm:$0xff]   ;;  %v2355_v12 = vld [vmem:[%s3450_s1 + $0xa8] ss:$16 sps:$4 sm:$0xff]  }
   0x5   :  { %v2356_v13 = vld [vmem:[%s3450_s1 + $0x84] ss:$16 sps:$4 sm:$0xff]   ;;  %v2358_v14 = vld [vmem:[%s3450_s1 + $0x8c] ss:$16 sps:$4 sm:$0xff]   ;;  %v2360_v15 = vld [vmem:[%s3450_s1 + $0x80] ss:$16 sps:$4 sm:$0xff]  }
   0x6   :  { %v2361_v16 = vld [vmem:[%s3450_s1 + $0x88] ss:$16 sps:$4 sm:$0xff]   ;;  %v2362_v17 = vld [vmem:[%s3450_s1 + $0x64] ss:$16 sps:$4 sm:$0xff]   ;;  %v2364_v18 = vld [vmem:[%s3450_s1 + $0x6c] ss:$16 sps:$4 sm:$0xff]  }
   0x7   :  { %270 = vmatpush1.bf16.msra.mxu0 %v2348_v7  ;;  %313 = vmatpush1.bf16.msra.mxu1 %v2349_v8  ;;  %v2366_v19 = vld [vmem:[%s3450_s1 + $0x60] ss:$16 sps:$4 sm:$0xff]   ;;  %v2367_v20 = vld [vmem:[%s3450_s1 + $0x68] ss:$16 sps:$4 sm:$0xff]   ;;  %v2368_v21 = vld [vmem:[%s3450_s1 + $0x44] ss:$16 sps:$4 sm:$0xff]  }
   0x8   :  { %271 = vmatprep.subr.bf16.mxu0 %v2350_v9  ;;  %314 = vmatprep.subr.bf16.mxu1 %v2352_v10  ;;  %v2370_v22 = vld [vmem:[%s3450_s1 + $0x4c] ss:$16 sps:$4 sm:$0xff]   ;;  %v2372_v23 = vld [vmem:[%s3450_s1 + $0x40] ss:$16 sps:$4 sm:$0xff]   ;;  %v2373_v24 = vld [vmem:[%s3450_s1 + $0x48] ss:$16 sps:$4 sm:$0xff]  }
   0x9   :  { %v2374_v25 = vld [vmem:[%s3450_s1 + $0x24] ss:$16 sps:$4 sm:$0xff]   ;;  %v2376_v26 = vld [vmem:[%s3450_s1 + $0x2c] ss:$16 sps:$4 sm:$0xff]   ;;  %v2378_v27 = vld [vmem:[%s3450_s1 + $0x20] ss:$16 sps:$4 sm:$0xff]  }
   0xa   :  { %v2379_v28 = vld [vmem:[%s3450_s1 + $0x28] ss:$16 sps:$4 sm:$0xff]   ;;  %v2380_v29 = vld [vmem:[%s3450_s1 + $0x4] ss:$16 sps:$4 sm:$0xff]   ;;  %v2382_v30 = vld [vmem:[%s3450_s1 + $0xc] ss:$16 sps:$4 sm:$0xff]  }
   0xb   :  { %272 = vmatpush1.bf16.msra.mxu0 %v2354_v11  ;;  %315 = vmatpush1.bf16.msra.mxu1 %v2355_v12  ;;  %v2384_v31 = vld [vmem:[%s3450_s1] ss:$16 sps:$4 sm:$0xff]   ;;  %v2385_v32 = vld [vmem:[%s3450_s1 + $0x8] ss:$16 sps:$4 sm:$0xff]   ;;  %v2389_v33 = vld [vmem:[%s3452_s3 + $0x74] ss:$8 sps:$4 sm:$0xff]  }
   0xc   :  { %273 = vmatprep.subr.bf16.mxu0 %v2356_v13  ;;  %316 = vmatprep.subr.bf16.mxu1 %v2358_v14  ;;  %v2392_v34 = vld [vmem:[%s3452_s3 + $0x174] ss:$8 sps:$4 sm:$0xff]   ;;  %v2386_v35 = vld [vmem:[%s3451_s0] sm:$0xff]   ;;  %v2387_v36 = vld [vmem:[%s3452_s3 + $0x70] ss:$8 sps:$4 sm:$0xff]  }
   0xd   :  { %v2390_v37 = vld [vmem:[%s3452_s3 + $0x170] ss:$8 sps:$4 sm:$0xff]   ;;  %v2395_v38 = vld [vmem:[%s3452_s3 + $0x64] ss:$8 sps:$4 sm:$0xff]   ;;  %v2393_v40 = vld [vmem:[%s3452_s3 + $0x60] ss:$8 sps:$4 sm:$0xff]  }
   0xe   :  { %v2398_v39 = vld [vmem:[%s3452_s3 + $0x164] ss:$8 sps:$4 sm:$0xff]   ;;  %v2396_v41 = vld [vmem:[%s3452_s3 + $0x160] ss:$8 sps:$4 sm:$0xff]   ;;  %v2401_v42 = vld [vmem:[%s3452_s3 + $0x54] ss:$8 sps:$4 sm:$0xff]  }
   0xf   :  { %274 = vmatpush1.bf16.msra.mxu0 %v2360_v15  ;;  %317 = vmatpush1.bf16.msra.mxu1 %v2361_v16  ;;  %v2404_v43 = vld [vmem:[%s3452_s3 + $0x154] ss:$8 sps:$4 sm:$0xff]   ;;  %v2399_v44 = vld [vmem:[%s3452_s3 + $0x50] ss:$8 sps:$4 sm:$0xff]   ;;  %v2407_v46 = vld [vmem:[%s3452_s3 + $0x44] ss:$8 sps:$4 sm:$0xff]  }
  0x10   :  { %275 = vmatprep.subr.bf16.mxu0 %v2362_v17  ;;  %318 = vmatprep.subr.bf16.mxu1 %v2364_v18  ;;  %v2402_v45 = vld [vmem:[%s3452_s3 + $0x150] ss:$8 sps:$4 sm:$0xff]   ;;  %v2410_v47 = vld [vmem:[%s3452_s3 + $0x144] ss:$8 sps:$4 sm:$0xff]   ;;  %v2405_v48 = vld [vmem:[%s3452_s3 + $0x40] ss:$8 sps:$4 sm:$0xff]  }
  0x11   :  { %v2408_v49 = vld [vmem:[%s3452_s3 + $0x140] ss:$8 sps:$4 sm:$0xff]   ;;  %v2413_v50 = vld [vmem:[%s3452_s3 + $0x34] ss:$8 sps:$4 sm:$0xff]   ;;  %v2411_v52 = vld [vmem:[%s3452_s3 + $0x30] ss:$8 sps:$4 sm:$0xff]  }
  0x12   :  { %v2416_v51 = vld [vmem:[%s3452_s3 + $0x134] ss:$8 sps:$4 sm:$0xff]   ;;  %v2414_v53 = vld [vmem:[%s3452_s3 + $0x130] ss:$8 sps:$4 sm:$0xff]   ;;  %v2419_v54 = vld [vmem:[%s3452_s3 + $0x24] ss:$8 sps:$4 sm:$0xff]  }
  0x13   :  { %276 = vmatpush1.bf16.msra.mxu0 %v2366_v19  ;;  %319 = vmatpush1.bf16.msra.mxu1 %v2367_v20  ;;  %v2422_v55 = vld [vmem:[%s3452_s3 + $0x124] ss:$8 sps:$4 sm:$0xff]   ;;  %v2417_v56 = vld [vmem:[%s3452_s3 + $0x20] ss:$8 sps:$4 sm:$0xff]   ;;  %v2425_v58 = vld [vmem:[%s3452_s3 + $0x14] ss:$8 sps:$4 sm:$0xff]  }
  0x14   :  { %277 = vmatprep.subr.bf16.mxu0 %v2368_v21  ;;  %320 = vmatprep.subr.bf16.mxu1 %v2370_v22  ;;  %v2420_v57 = vld [vmem:[%s3452_s3 + $0x120] ss:$8 sps:$4 sm:$0xff]   ;;  %v2428_v59 = vld [vmem:[%s3452_s3 + $0x114] ss:$8 sps:$4 sm:$0xff]   ;;  %v2423_v60 = vld [vmem:[%s3452_s3 + $0x10] ss:$8 sps:$4 sm:$0xff]  }
  0x15   :  { %v2426_v61 = vld [vmem:[%s3452_s3 + $0x110] ss:$8 sps:$4 sm:$0xff]   ;;  %v2431_v62 = vld [vmem:[%s3452_s3 + $0x4] ss:$8 sps:$4 sm:$0xff]   ;;  %v2429_v0 = vld [vmem:[%s3452_s3] ss:$8 sps:$4 sm:$0xff]  }
  0x16   :  { %v2434_v63 = vld [vmem:[%s3452_s3 + $0x104] ss:$8 sps:$4 sm:$0xff]   ;;  %v2432_v2 = vld [vmem:[%s3452_s3 + $0x100] ss:$8 sps:$4 sm:$0xff]   ;;  %v2437_v3 = vld [vmem:[%s3452_s3 + $0xf4] ss:$8 sps:$4 sm:$0xff]  }
  0x17   :  { %278 = vmatpush1.bf16.msra.mxu0 %v2372_v23  ;;  %321 = vmatpush1.bf16.msra.mxu1 %v2373_v24  ;;  %v2440_v4 = vld [vmem:[%s3452_s3 + $0x1f4] ss:$8 sps:$4 sm:$0xff]   ;;  %v2435_v5 = vld [vmem:[%s3452_s3 + $0xf0] ss:$8 sps:$4 sm:$0xff]   ;;  %v2443_v7 = vld [vmem:[%s3452_s3 + $0xe4] ss:$8 sps:$4 sm:$0xff]  }
  0x18   :  { %279 = vmatprep.subr.bf16.mxu0 %v2374_v25  ;;  %322 = vmatprep.subr.bf16.mxu1 %v2376_v26  ;;  %v2438_v6 = vld [vmem:[%s3452_s3 + $0x1f0] ss:$8 sps:$4 sm:$0xff]   ;;  %v2446_v8 = vld [vmem:[%s3452_s3 + $0x1e4] ss:$8 sps:$4 sm:$0xff]   ;;  %v2441_v9 = vld [vmem:[%s3452_s3 + $0xe0] ss:$8 sps:$4 sm:$0xff]  }
  0x19   :  { %v2444_v10 = vld [vmem:[%s3452_s3 + $0x1e0] ss:$8 sps:$4 sm:$0xff]   ;;  %v2449_v11 = vld [vmem:[%s3452_s3 + $0xd4] ss:$8 sps:$4 sm:$0xff]   ;;  %v2447_v13 = vld [vmem:[%s3452_s3 + $0xd0] ss:$8 sps:$4 sm:$0xff]  }
  0x1a   :  { %v2452_v12 = vld [vmem:[%s3452_s3 + $0x1d4] ss:$8 sps:$4 sm:$0xff]   ;;  %v2450_v14 = vld [vmem:[%s3452_s3 + $0x1d0] ss:$8 sps:$4 sm:$0xff]   ;;  %v2455_v15 = vld [vmem:[%s3452_s3 + $0xc4] ss:$8 sps:$4 sm:$0xff]  }
  0x1b   :  { %280 = vmatpush1.bf16.msra.mxu0 %v2378_v27  ;;  %323 = vmatpush1.bf16.msra.mxu1 %v2379_v28  ;;  %v2458_v16 = vld [vmem:[%s3452_s3 + $0x1c4] ss:$8 sps:$4 sm:$0xff]   ;;  %v2453_v17 = vld [vmem:[%s3452_s3 + $0xc0] ss:$8 sps:$4 sm:$0xff]   ;;  %v2461_v19 = vld [vmem:[%s3452_s3 + $0xb4] ss:$8 sps:$4 sm:$0xff]  }
  0x1c   :  { %281 = vmatprep.subr.bf16.mxu0 %v2380_v29  ;;  %324 = vmatprep.subr.bf16.mxu1 %v2382_v30  ;;  %v2456_v18 = vld [vmem:[%s3452_s3 + $0x1c0] ss:$8 sps:$4 sm:$0xff]   ;;  %v2464_v20 = vld [vmem:[%s3452_s3 + $0x1b4] ss:$8 sps:$4 sm:$0xff]   ;;  %v2459_v21 = vld [vmem:[%s3452_s3 + $0xb0] ss:$8 sps:$4 sm:$0xff]  }
  0x1d   :  { %v2462_v22 = vld [vmem:[%s3452_s3 + $0x1b0] ss:$8 sps:$4 sm:$0xff]   ;;  %v2467_v23 = vld [vmem:[%s3452_s3 + $0xa4] ss:$8 sps:$4 sm:$0xff]   ;;  %v2465_v25 = vld [vmem:[%s3452_s3 + $0xa0] ss:$8 sps:$4 sm:$0xff]  }
  0x1e   :  { %v2470_v24 = vld [vmem:[%s3452_s3 + $0x1a4] ss:$8 sps:$4 sm:$0xff]   ;;  %v2468_v26 = vld [vmem:[%s3452_s3 + $0x1a0] ss:$8 sps:$4 sm:$0xff]   ;;  %v2473_v27 = vld [vmem:[%s3452_s3 + $0x94] ss:$8 sps:$4 sm:$0xff]  }
  0x1f   :  { %282 = vmatpush1.bf16.msra.mxu0 %v2384_v31  ;;  %325 = vmatpush1.bf16.msra.mxu1 %v2385_v32  ;;  %v2476_v28 = vld [vmem:[%s3452_s3 + $0x194] ss:$8 sps:$4 sm:$0xff]   ;;  %v2471_v29 = vld [vmem:[%s3452_s3 + $0x90] ss:$8 sps:$4 sm:$0xff]   ;;  %v2479_v31 = vld [vmem:[%s3452_s3 + $0x84] ss:$8 sps:$4 sm:$0xff]  }
  0x20   :  { %761 = vmatprep.subr.bf16.mxu0 %v2389_v33  ;;  %804 = vmatprep.subr.bf16.mxu1 %v2392_v34  ;;  %v2474_v30 = vld [vmem:[%s3452_s3 + $0x190] ss:$8 sps:$4 sm:$0xff]   ;;  %v2482_v32 = vld [vmem:[%s3452_s3 + $0x184] ss:$8 sps:$4 sm:$0xff]   ;;  %v2477_v33 = vld [vmem:[%s3452_s3 + $0x80] ss:$8 sps:$4 sm:$0xff]  }
  0x21   :  { %v2480_v34 = vld [vmem:[%s3452_s3 + $0x180] ss:$8 sps:$4 sm:$0xff]  }
  0x22   :  { %300 = vmatmul.mubr.bf16.vlgmr.msra.gmra.mxu0 %v2386_v35  ;;  %343 = vmatmul.mubr.bf16.vlgmr.msra.gmra.mxu1 %v2386_v35  ;;  %v2483_v35 = vld [vmem:[%s3453_s5 + $0x78] sm:$0xff]  }
  0x23   :  { %762 = vmatpush1.bf16.msra.mxu0 %v2387_v36  ;;  %805 = vmatpush1.bf16.msra.mxu1 %v2390_v37  ;;  %v81_v36 = vlaneseq }
  0x24   :  { %763 = vmatprep.subr.bf16.mxu0 %v2395_v38  ;;  %806 = vmatprep.subr.bf16.mxu1 %v2398_v39 }
  0x25   :  { %v3018_v37 = vshrl.u32 %v81_v36, 7  ;;  %v429_v36 = vld [vmem:[%s3456_s4] sm:$0x3] }
  0x27   :  { %764 = vmatpush1.bf16.msra.mxu0 %v2393_v40  ;;  %807 = vmatpush1.bf16.msra.mxu1 %v2396_v41  ;;  %v3021_v38 = vsub.s32 1, %v3018_v37  ;;  %v95_v39 = vsub.s32 3, %v3018_v37  ;;  %v3025_v40 = vsub.s32 0, %v3018_v37  ;;  %v91_v41 = vsub.s32 2, %v3018_v37 }
  0x28   :  { %765 = vmatprep.subr.bf16.mxu0 %v2401_v42  ;;  %808 = vmatprep.subr.bf16.mxu1 %v2404_v43  ;;  %v79_v42 = vld [vmem:[%s3454_s2] sm:$0xf] }
  0x2b   :  { %766 = vmatpush1.bf16.msra.mxu0 %v2399_v44  ;;  %809 = vmatpush1.bf16.msra.mxu1 %v2402_v45  ;;  %v88_v45 = vrot.slane %v79_v42, %v3021_v38 }
  0x2c   :  { %767 = vmatprep.subr.bf16.mxu0 %v2407_v46  ;;  %810 = vmatprep.subr.bf16.mxu1 %v2410_v47  ;;  %v96_v46 = vrot.slane %v79_v42, %v95_v39  ;;  %v84_v47 = vrot.slane %v79_v42, %v3025_v40 }
  0x2f   :  { %768 = vmatpush1.bf16.msra.mxu0 %v2405_v48  ;;  %811 = vmatpush1.bf16.msra.mxu1 %v2408_v49  ;;  %v92_v48 = vrot.slane %v79_v42, %v91_v41  ;;  %v438_v42 = vrot.slane %v429_v36, %v3021_v38 }
  0x30   :  { %769 = vmatprep.subr.bf16.mxu0 %v2413_v50  ;;  %812 = vmatprep.subr.bf16.mxu1 %v2416_v51 }
  0x33   :  { %770 = vmatpush1.bf16.msra.mxu0 %v2411_v52  ;;  %813 = vmatpush1.bf16.msra.mxu1 %v2414_v53 }
  0x34   :  { %771 = vmatprep.subr.bf16.mxu0 %v2419_v54  ;;  %814 = vmatprep.subr.bf16.mxu1 %v2422_v55 }
  0x37   :  { %772 = vmatpush1.bf16.msra.mxu0 %v2417_v56  ;;  %815 = vmatpush1.bf16.msra.mxu1 %v2420_v57 }
  0x38   :  { %773 = vmatprep.subr.bf16.mxu0 %v2425_v58  ;;  %816 = vmatprep.subr.bf16.mxu1 %v2428_v59 }
  0x3b   :  { %774 = vmatpush1.bf16.msra.mxu0 %v2423_v60  ;;  %817 = vmatpush1.bf16.msra.mxu1 %v2426_v61 }
  0x3c   :  { %775 = vmatprep.subr.bf16.mxu0 %v2431_v62  ;;  %818 = vmatprep.subr.bf16.mxu1 %v2434_v63 }
  0x3f   :  { %776 = vmatpush1.bf16.msra.mxu0 %v2429_v0  ;;  %819 = vmatpush1.bf16.msra.mxu1 %v2432_v2 }
  0x40   :  { %777 = vmatprep.subr.bf16.mxu0 %v2437_v3  ;;  %820 = vmatprep.subr.bf16.mxu1 %v2440_v4 }
  0x43   :  { %778 = vmatpush2.bf16.msra.mxu0 %v2435_v5  ;;  %821 = vmatpush2.bf16.msra.mxu1 %v2438_v6 }
  0x44   :  { %779 = vmatprep.subr.bf16.mxu0 %v2443_v7  ;;  %822 = vmatprep.subr.bf16.mxu1 %v2446_v8 }
  0x47   :  { %780 = vmatpush2.bf16.msra.mxu0 %v2441_v9  ;;  %823 = vmatpush2.bf16.msra.mxu1 %v2444_v10  ;;  %v2484_v10 = vld [vmem:[%s3453_s5 + $0x38] sm:$0xff]  }
  0x48   :  { %781 = vmatprep.subr.bf16.mxu0 %v2449_v11  ;;  %824 = vmatprep.subr.bf16.mxu1 %v2452_v12 }
  0x4b   :  { %782 = vmatpush2.bf16.msra.mxu0 %v2447_v13  ;;  %825 = vmatpush2.bf16.msra.mxu1 %v2450_v14  ;;  %v2485_v13 = vld [vmem:[%s3453_s5 + $0x70] sm:$0xff]  }
  0x4c   :  { %783 = vmatprep.subr.bf16.mxu0 %v2455_v15  ;;  %826 = vmatprep.subr.bf16.mxu1 %v2458_v16  ;;  %v2486_v14 = vld [vmem:[%s3453_s5 + $0x30] sm:$0xff]   ;;  %v2487_v15 = vld [vmem:[%s3453_s5 + $0x68] sm:$0xff]  }
  0x4d   :  { %v2488_v16 = vld [vmem:[%s3453_s5 + $0x28] sm:$0xff]  }
  0x4f   :  { %784 = vmatpush2.bf16.msra.mxu0 %v2453_v17  ;;  %827 = vmatpush2.bf16.msra.mxu1 %v2456_v18  ;;  %v2489_v17 = vld [vmem:[%s3453_s5 + $0x60] sm:$0xff]   ;;  %v2491_v18 = vld [vmem:[%s3453_s5 + $0x58] sm:$0xff]  }
  0x50   :  { %785 = vmatprep.subr.bf16.mxu0 %v2461_v19  ;;  %828 = vmatprep.subr.bf16.mxu1 %v2464_v20  ;;  %v2492_v19 = vld [vmem:[%s3453_s5 + $0x18] sm:$0xff]   ;;  %v2493_v20 = vld [vmem:[%s3453_s5 + $0x50] sm:$0xff]  }
  0x53   :  { %786 = vmatpush2.bf16.msra.mxu0 %v2459_v21  ;;  %829 = vmatpush2.bf16.msra.mxu1 %v2462_v22  ;;  %v2494_v21 = vld [vmem:[%s3453_s5 + $0x10] sm:$0xff]   ;;  %v2495_v22 = vld [vmem:[%s3453_s5 + $0x48] sm:$0xff]  }
  0x54   :  { %787 = vmatprep.subr.bf16.mxu0 %v2467_v23  ;;  %830 = vmatprep.subr.bf16.mxu1 %v2470_v24  ;;  %v2496_v23 = vld [vmem:[%s3453_s5 + $0x8] sm:$0xff]   ;;  %v2497_v24 = vld [vmem:[%s3453_s5 + $0x40] sm:$0xff]  }
  0x57   :  { %788 = vmatpush2.bf16.msra.mxu0 %v2465_v25  ;;  %831 = vmatpush2.bf16.msra.mxu1 %v2468_v26  ;;  %v2498_v25 = vld [vmem:[%s3453_s5] sm:$0xff]   ;;  %v2499_v26 = vld [vmem:[%s3455_s7 + $0x70] ss:$8 sps:$4 sm:$0xff]  }
  0x58   :  { %789 = vmatprep.subr.bf16.mxu0 %v2473_v27  ;;  %832 = vmatprep.subr.bf16.mxu1 %v2476_v28  ;;  %v2501_v27 = vld [vmem:[%s3455_s7 + $0x74] ss:$8 sps:$4 sm:$0xff]   ;;  %v2504_v28 = vld [vmem:[%s3455_s7 + $0x64] ss:$8 sps:$4 sm:$0xff]  }
  0x5b   :  { %790 = vmatpush2.bf16.msra.mxu0 %v2471_v29  ;;  %833 = vmatpush2.bf16.msra.mxu1 %v2474_v30  ;;  %v2502_v29 = vld [vmem:[%s3455_s7 + $0x60] ss:$8 sps:$4 sm:$0xff]   ;;  %v2507_v30 = vld [vmem:[%s3455_s7 + $0x54] ss:$8 sps:$4 sm:$0xff]  }
  0x5c   :  { %791 = vmatprep.subr.bf16.mxu0 %v2479_v31  ;;  %834 = vmatprep.subr.bf16.mxu1 %v2482_v32  ;;  %v2505_v31 = vld [vmem:[%s3455_s7 + $0x50] ss:$8 sps:$4 sm:$0xff]   ;;  %v2510_v32 = vld [vmem:[%s3455_s7 + $0x44] ss:$8 sps:$4 sm:$0xff]  }
  0x5f   :  { %792 = vmatpush2.bf16.msra.mxu0 %v2477_v33  ;;  %835 = vmatpush2.bf16.msra.mxu1 %v2480_v34  ;;  %v2508_v33 = vld [vmem:[%s3455_s7 + $0x40] ss:$8 sps:$4 sm:$0xff]   ;;  %v2513_v34 = vld [vmem:[%s3455_s7 + $0x34] ss:$8 sps:$4 sm:$0xff]  }
  0x60   :  { %2271 = vmatprep.subr.bf16.mxu0 %v2483_v35  ;;  %1140 = vmatprep.subr.bf16.mxu1 %v2501_v27  ;;  %v2511_v35 = vld [vmem:[%s3455_s7 + $0x30] ss:$8 sps:$4 sm:$0xff]   ;;  %v2579_v27 = vld [vmem:[%s3457_s9 + $0x1c4] ss:$16 sps:$4 sm:$0xff]  }
  0xe2   :  { %v301_v43 = vpop.f32.mrf.mxu0  ;;  %v344_v44 = vpop.f32.mrf.mxu1 }
  0xe3   :  { %v302_v57 = vadd.f32 %v301_v43, %v84_v47  ;;  %v345_v58 = vadd.f32 %v344_v44, %v92_v48  ;;  %v434_v43 = vrot.slane %v429_v36, %v3025_v40 }
  0xe4   :  { %v303_v49 = vpop.f32.mrf.mxu0  ;;  %v346_v50 = vpop.f32.mrf.mxu1 }
  0xe5   :  { %v304_v53 = vadd.f32 %v303_v49, %v88_v45  ;;  %v347_v54 = vadd.f32 %v346_v50, %v96_v46  ;;  %v353_v6 = vmax.f32 %v302_v57, 0.0  ;;  %v355_v7 = vmax.f32 %v345_v58, 0.0 }
  0xe6   :  { %v305_v51 = vpop.f32.mrf.mxu0  ;;  %v348_v52 = vpop.f32.mrf.mxu1 }
  0xe7   :  { %v306_v55 = vadd.f32 %v305_v51, %v84_v47  ;;  %v349_v56 = vadd.f32 %v348_v52, %v92_v48  ;;  %v354_v2 = vmax.f32 %v304_v53, 0.0  ;;  %v356_v3 = vmax.f32 %v347_v54, 0.0 }
  0xe8   :  { %v307_v59 = vpop.f32.mrf.mxu0  ;;  %v350_v60 = vpop.f32.mrf.mxu1 }
  0xe9   :  { %v308_v61 = vadd.f32 %v307_v59, %v88_v45  ;;  %v351_v62 = vadd.f32 %v350_v60, %v96_v46  ;;  %v357_v63 = vmax.f32 %v306_v55, 0.0  ;;  %v359_v0 = vmax.f32 %v349_v56, 0.0 }
  0xeb   :  { %v358_v4 = vmax.f32 %v308_v61, 0.0  ;;  %v360_v5 = vmax.f32 %v351_v62, 0.0  ;;  %v361_v11 = vpack.c.bf16 %v357_v63, %v353_v6  ;;  %v363_v12 = vpack.c.bf16 %v359_v0, %v355_v7  ;;  %v2517_v6 = vld [vmem:[%s3455_s7 + $0x10] ss:$8 sps:$4 sm:$0xff]   ;;  %v2522_v7 = vld [vmem:[%s3455_s7 + $0x4] ss:$8 sps:$4 sm:$0xff]  }
  0xed   :  { %v362_v8 = vpack.c.bf16 %v358_v4, %v354_v2  ;;  %v364_v9 = vpack.c.bf16 %v360_v5, %v356_v3  ;;  %v2516_v3 = vld [vmem:[%s3455_s7 + $0x24] ss:$8 sps:$4 sm:$0xff]   ;;  %v2514_v4 = vld [vmem:[%s3455_s7 + $0x20] ss:$8 sps:$4 sm:$0xff]   ;;  %v2519_v5 = vld [vmem:[%s3455_s7 + $0x14] ss:$8 sps:$4 sm:$0xff]  }
  0xef   :  { %793 = vmatprep.mubr.bf16.mxu0 %v362_v8  ;;  %836 = vmatprep.mubr.bf16.mxu1 %v364_v9  ;;  %v2520_v8 = vld [vmem:[%s3455_s7] ss:$8 sps:$4 sm:$0xff]  }
  0xf0   :  { %794 = vmatmul.mubr.bf16.vlgmr.msra.gmra.mxu0 %v361_v11  ;;  %837 = vmatmul.mubr.bf16.vlgmr.msra.gmra.mxu1 %v363_v12  ;;  %v2523_v9 = vld [vmem:[%s3457_s9 + $0xe0] ss:$16 sps:$4 sm:$0xff]   ;;  %v2528_v11 = vld [vmem:[%s3457_s9 + $0xec] ss:$16 sps:$4 sm:$0xff]   ;;  %v2531_v12 = vld [vmem:[%s3457_s9 + $0xc4] ss:$16 sps:$4 sm:$0xff]  }
  0xf1   :  { %2272 = vmatpush3.bf16.msra.mxu0 %v2484_v10  ;;  %1172 = vmatprep.mubr.bf16.mxu1 %v2651_v1  ;;  %v2490_v1 = vld [vmem:[%s3453_s5 + $0x20] sm:$0xff]  }
  0xf2   :  { %2273 = vmatprep.subr.bf16.mxu0 %v2485_v13  ;;  %1141 = vmatpush1.bf16.msra.mxu1 %v2499_v26  ;;  %v2525_v10 = vld [vmem:[%s3457_s9 + $0xe4] ss:$16 sps:$4 sm:$0xff]   ;;  %v2529_v13 = vld [vmem:[%s3457_s9 + $0xc0] ss:$16 sps:$4 sm:$0xff]  }
  0xf3   :  { %1142 = vmatprep.subr.bf16.mxu1 %v2504_v28  ;;  %v2571_v26 = vld [vmem:[%s3457_s9 + $0x1e0] ss:$16 sps:$4 sm:$0xff]  }
  0xf4   :  { %v2577_v28 = vld [vmem:[%s3457_s9 + $0x1c0] ss:$16 sps:$4 sm:$0xff]  }
  0xf5   :  { %2274 = vmatpush3.bf16.msra.mxu0 %v2486_v14  ;;  %v2537_v14 = vld [vmem:[%s3457_s9 + $0xa4] ss:$16 sps:$4 sm:$0xff]  }
  0xf6   :  { %2275 = vmatprep.subr.bf16.mxu0 %v2487_v15  ;;  %1143 = vmatpush1.bf16.msra.mxu1 %v2502_v29  ;;  %v2535_v15 = vld [vmem:[%s3457_s9 + $0xa0] ss:$16 sps:$4 sm:$0xff]   ;;  %v2585_v29 = vld [vmem:[%s3457_s9 + $0x1a4] ss:$16 sps:$4 sm:$0xff]  }
  0xf7   :  { %1144 = vmatprep.subr.bf16.mxu1 %v2507_v30  ;;  %v2583_v30 = vld [vmem:[%s3457_s9 + $0x1a0] ss:$16 sps:$4 sm:$0xff]  }
  0xf9   :  { %2276 = vmatpush3.bf16.msra.mxu0 %v2488_v16  ;;  %v2543_v16 = vld [vmem:[%s3457_s9 + $0x84] ss:$16 sps:$4 sm:$0xff]  }
  0xfa   :  { %2277 = vmatprep.subr.bf16.mxu0 %v2489_v17  ;;  %1145 = vmatpush1.bf16.msra.mxu1 %v2505_v31  ;;  %v2541_v17 = vld [vmem:[%s3457_s9 + $0x80] ss:$16 sps:$4 sm:$0xff]   ;;  %v2591_v31 = vld [vmem:[%s3457_s9 + $0x184] ss:$16 sps:$4 sm:$0xff]  }
  0xfb   :  { %1146 = vmatprep.subr.bf16.mxu1 %v2510_v32  ;;  %v2589_v32 = vld [vmem:[%s3457_s9 + $0x180] ss:$16 sps:$4 sm:$0xff]  }
  0xfd   :  { %2278 = vmatpush3.bf16.msra.mxu0 %v2490_v1  ;;  %v2549_v1 = vld [vmem:[%s3457_s9 + $0x64] ss:$16 sps:$4 sm:$0xff]  }
  0xfe   :  { %2279 = vmatprep.subr.bf16.mxu0 %v2491_v18  ;;  %1147 = vmatpush1.bf16.msra.mxu1 %v2508_v33  ;;  %v2547_v18 = vld [vmem:[%s3457_s9 + $0x60] ss:$16 sps:$4 sm:$0xff]   ;;  %v2597_v33 = vld [vmem:[%s3457_s9 + $0x164] ss:$16 sps:$4 sm:$0xff]  }
  0xff   :  { %1148 = vmatprep.subr.bf16.mxu1 %v2513_v34  ;;  %v2595_v34 = vld [vmem:[%s3457_s9 + $0x160] ss:$16 sps:$4 sm:$0xff]  }
 0x101   :  { %2280 = vmatpush3.bf16.msra.mxu0 %v2492_v19  ;;  %v2555_v19 = vld [vmem:[%s3457_s9 + $0x44] ss:$16 sps:$4 sm:$0xff]  }
 0x102   :  { %2281 = vmatprep.subr.bf16.mxu0 %v2493_v20  ;;  %1149 = vmatpush1.bf16.msra.mxu1 %v2511_v35  ;;  %v2553_v20 = vld [vmem:[%s3457_s9 + $0x40] ss:$16 sps:$4 sm:$0xff]  }
 0x103   :  { %1150 = vmatprep.subr.bf16.mxu1 %v2516_v3  ;;  %v2568_v3 = vld [vmem:[%s3457_s9 + $0x8] ss:$16 sps:$4 sm:$0xff]  }
 0x105   :  { %2282 = vmatpush3.bf16.msra.mxu0 %v2494_v21  ;;  %v2561_v21 = vld [vmem:[%s3457_s9 + $0x24] ss:$16 sps:$4 sm:$0xff]  }
 0x106   :  { %2283 = vmatprep.subr.bf16.mxu0 %v2495_v22  ;;  %1151 = vmatpush1.bf16.msra.mxu1 %v2514_v4  ;;  %v2559_v22 = vld [vmem:[%s3457_s9 + $0x20] ss:$16 sps:$4 sm:$0xff]   ;;  %v2576_v4 = vld [vmem:[%s3457_s9 + $0x1ec] ss:$16 sps:$4 sm:$0xff]  }
 0x107   :  { %1152 = vmatprep.subr.bf16.mxu1 %v2519_v5  ;;  %v2574_v5 = vld [vmem:[%s3457_s9 + $0x1e8] ss:$16 sps:$4 sm:$0xff]  }
 0x109   :  { %2284 = vmatpush3.bf16.msra.mxu0 %v2496_v23  ;;  %v2567_v23 = vld [vmem:[%s3457_s9 + $0x4] ss:$16 sps:$4 sm:$0xff]  }
 0x10a   :  { %2285 = vmatprep.subr.bf16.mxu0 %v2497_v24  ;;  %1153 = vmatpush1.bf16.msra.mxu1 %v2517_v6  ;;  %v2565_v24 = vld [vmem:[%s3457_s9] ss:$16 sps:$4 sm:$0xff]   ;;  %v2582_v6 = vld [vmem:[%s3457_s9 + $0x1cc] ss:$16 sps:$4 sm:$0xff]  }
 0x10b   :  { %1154 = vmatprep.subr.bf16.mxu1 %v2522_v7  ;;  %v2580_v7 = vld [vmem:[%s3457_s9 + $0x1c8] ss:$16 sps:$4 sm:$0xff]  }
 0x10d   :  { %2286 = vmatpush3.bf16.msra.mxu0 %v2498_v25  ;;  %v2573_v25 = vld [vmem:[%s3457_s9 + $0x1e4] ss:$16 sps:$4 sm:$0xff]  }
 0x10e   :  { %1155 = vmatpush1.bf16.msra.mxu1 %v2520_v8  ;;  %1595 = vmatprep.subr.bf16.mxu0 %v2525_v10  ;;  %v2588_v8 = vld [vmem:[%s3457_s9 + $0x1ac] ss:$16 sps:$4 sm:$0xff]  }
 0x10f   :  { %1638 = vmatprep.subr.bf16.mxu1 %v2528_v11  ;;  %v2594_v10 = vld [vmem:[%s3457_s9 + $0x18c] ss:$16 sps:$4 sm:$0xff]   ;;  %v2592_v11 = vld [vmem:[%s3457_s9 + $0x188] ss:$16 sps:$4 sm:$0xff]  }
 0x1b0   :  { %v795_v44 = vpop.f32.mrf.mxu0  ;;  %v838_v45 = vpop.f32.mrf.mxu1 }
 0x1b1   :  { %v796_v49 = vadd.f32 %v795_v44, %v434_v43 }
 0x1b2   :  { %v797_v46 = vpop.f32.mrf.mxu0  ;;  %v840_v47 = vpop.f32.mrf.mxu1 }
 0x1b3   :  { %v798_v48 = vadd.f32 %v797_v46, %v438_v42  ;;  %v839_v57 = vadd.f32 %v838_v45, %v796_v49 }
 0x1b4   :  { %v799_v50 = vpop.f32.mrf.mxu0  ;;  %v842_v51 = vpop.f32.mrf.mxu1 }
 0x1b5   :  { %v800_v52 = vadd.f32 %v799_v50, %v434_v43  ;;  %v841_v54 = vadd.f32 %v840_v47, %v798_v48  ;;  %v847_v63 = vmax.f32 %v839_v57, 0.0  ;;  %v2141_v43 = vld [vmem:[%s3458_s6] ss:$0 sm:$0xff]  ;;  %v2546_v57 = vld [vmem:[%s3457_s9 + $0x8c] ss:$16 sps:$4 sm:$0xff]  }
 0x1b6   :  { %v801_v53 = vpop.f32.mrf.mxu0  ;;  %v844_v58 = vpop.f32.mrf.mxu1 }
 0x1b7   :  { %v843_v55 = vadd.f32 %v842_v51, %v800_v52  ;;  %v802_v56 = vadd.f32 %v801_v53, %v438_v42  ;;  %v848_v61 = vmax.f32 %v841_v54, 0.0  ;;  %v2526_v51 = vld [vmem:[%s3457_s9 + $0xe8] ss:$16 sps:$4 sm:$0xff]   ;;  %v2534_v53 = vld [vmem:[%s3457_s9 + $0xcc] ss:$16 sps:$4 sm:$0xff]  }
 0x1b8   :  { %v2532_v54 = vld [vmem:[%s3457_s9 + $0xc8] ss:$16 sps:$4 sm:$0xff]  }
 0x1b9   :  { %v845_v59 = vadd.f32 %v844_v58, %v802_v56  ;;  %v849_v60 = vmax.f32 %v843_v55, 0.0  ;;  %v2540_v55 = vld [vmem:[%s3457_s9 + $0xac] ss:$16 sps:$4 sm:$0xff]   ;;  %v2538_v56 = vld [vmem:[%s3457_s9 + $0xa8] ss:$16 sps:$4 sm:$0xff]  }
 0x1ba   :  { %v2544_v58 = vld [vmem:[%s3457_s9 + $0x88] ss:$16 sps:$4 sm:$0xff]  }
 0x1bb   :  { %v850_v62 = vmax.f32 %v845_v59, 0.0  ;;  %v851_v2 = vpack.c.bf16 %v849_v60, %v847_v63  ;;  %v2552_v59 = vld [vmem:[%s3457_s9 + $0x6c] ss:$16 sps:$4 sm:$0xff]   ;;  %v2550_v60 = vld [vmem:[%s3457_s9 + $0x68] ss:$16 sps:$4 sm:$0xff]  }
 0x1bc   :  { %v2564_v63 = vld [vmem:[%s3457_s9 + $0x2c] ss:$16 sps:$4 sm:$0xff]  }
 0x1bd   :  { %v852_v0 = vpack.c.bf16 %v850_v62, %v848_v61  ;;  %v2558_v61 = vld [vmem:[%s3457_s9 + $0x4c] ss:$16 sps:$4 sm:$0xff]   ;;  %v2556_v62 = vld [vmem:[%s3457_s9 + $0x48] ss:$16 sps:$4 sm:$0xff]  }
 0x1bf   :  { %1020 = vmatprep.mubr.bf16.mxu0 %v852_v0  ;;  %v2562_v0 = vld [vmem:[%s3457_s9 + $0x28] ss:$16 sps:$4 sm:$0xff]  }
 0x1c0   :  { %1021 = vmatmul.mubr.bf16.vlgmr.msra.gmra.mxu0 %v851_v2  ;;  %v2570_v2 = vld [vmem:[%s3457_s9 + $0xc] ss:$16 sps:$4 sm:$0xff]  }
 0x1c1   :  { %1596 = vmatpush1.bf16.msra.mxu0 %v2523_v9  ;;  %v2586_v9 = vld [vmem:[%s3457_s9 + $0x1a8] ss:$16 sps:$4 sm:$0xff]  }
 0x1c2   :  { %1597 = vmatprep.subr.bf16.mxu0 %v2531_v12  ;;  %v2600_v12 = vld [vmem:[%s3457_s9 + $0x16c] ss:$16 sps:$4 sm:$0xff]  }
 0x1c5   :  { %1598 = vmatpush1.bf16.msra.mxu0 %v2529_v13  ;;  %v2598_v13 = vld [vmem:[%s3457_s9 + $0x168] ss:$16 sps:$4 sm:$0xff]  }
 0x1c6   :  { %1599 = vmatprep.subr.bf16.mxu0 %v2537_v14  ;;  %v2603_v14 = vld [vmem:[%s3457_s9 + $0x144] ss:$16 sps:$4 sm:$0xff]  }
 0x1c9   :  { %1600 = vmatpush1.bf16.msra.mxu0 %v2535_v15  ;;  %v2606_v15 = vld [vmem:[%s3457_s9 + $0x14c] ss:$16 sps:$4 sm:$0xff]  }
 0x1ca   :  { %1601 = vmatprep.subr.bf16.mxu0 %v2543_v16  ;;  %v2601_v16 = vld [vmem:[%s3457_s9 + $0x140] ss:$16 sps:$4 sm:$0xff]  }
 0x1cd   :  { %1602 = vmatpush1.bf16.msra.mxu0 %v2541_v17  ;;  %v2604_v17 = vld [vmem:[%s3457_s9 + $0x148] ss:$16 sps:$4 sm:$0xff]  }
 0x1ce   :  { %1603 = vmatprep.subr.bf16.mxu0 %v2549_v1  ;;  %v2609_v1 = vld [vmem:[%s3457_s9 + $0x124] ss:$16 sps:$4 sm:$0xff]  }
 0x1d1   :  { %1604 = vmatpush1.bf16.msra.mxu0 %v2547_v18  ;;  %v2612_v18 = vld [vmem:[%s3457_s9 + $0x12c] ss:$16 sps:$4 sm:$0xff]  }
 0x1d2   :  { %1605 = vmatprep.subr.bf16.mxu0 %v2555_v19  ;;  %v2607_v19 = vld [vmem:[%s3457_s9 + $0x120] ss:$16 sps:$4 sm:$0xff]  }
 0x1d5   :  { %1606 = vmatpush1.bf16.msra.mxu0 %v2553_v20  ;;  %v2610_v20 = vld [vmem:[%s3457_s9 + $0x128] ss:$16 sps:$4 sm:$0xff]  }
 0x1d6   :  { %1607 = vmatprep.subr.bf16.mxu0 %v2561_v21  ;;  %v2615_v21 = vld [vmem:[%s3457_s9 + $0x104] ss:$16 sps:$4 sm:$0xff]  }
 0x1d9   :  { %1608 = vmatpush1.bf16.msra.mxu0 %v2559_v22  ;;  %v2618_v22 = vld [vmem:[%s3457_s9 + $0x10c] ss:$16 sps:$4 sm:$0xff]  }
 0x1da   :  { %1609 = vmatprep.subr.bf16.mxu0 %v2567_v23  ;;  %v2613_v23 = vld [vmem:[%s3457_s9 + $0x100] ss:$16 sps:$4 sm:$0xff]  }
 0x1dd   :  { %1610 = vmatpush1.bf16.msra.mxu0 %v2565_v24  ;;  %v2616_v24 = vld [vmem:[%s3457_s9 + $0x108] ss:$16 sps:$4 sm:$0xff]  }
 0x1de   :  { %1611 = vmatprep.subr.bf16.mxu0 %v2573_v25  ;;  %v2619_v25 = vld [vmem:[%s3459_s11 + $0x78] sm:$0xff]  }
 0x1e1   :  { %1612 = vmatpush2.bf16.msra.mxu0 %v2571_v26  ;;  %v2620_v26 = vld [vmem:[%s3459_s11 + $0xf8] sm:$0xff]  }
 0x1e2   :  { %1613 = vmatprep.subr.bf16.mxu0 %v2579_v27  ;;  %v1048_v27 = vld [vmem:[%s3460_s8] sm:$0x3] }
 0x1e5   :  { %1614 = vmatpush2.bf16.msra.mxu0 %v2577_v28 }
 0x1e6   :  { %1615 = vmatprep.subr.bf16.mxu0 %v2585_v29  ;;  %v1057_v29 = vrot.slane %v1048_v27, %v3021_v38 }
 0x1e9   :  { %1616 = vmatpush2.bf16.msra.mxu0 %v2583_v30  ;;  %v1053_v30 = vrot.slane %v1048_v27, %v3025_v40 }
 0x1ea   :  { %1617 = vmatprep.subr.bf16.mxu0 %v2591_v31 }
 0x1ed   :  { %1618 = vmatpush2.bf16.msra.mxu0 %v2589_v32 }
 0x1ee   :  { %1619 = vmatprep.subr.bf16.mxu0 %v2597_v33 }
 0x1f1   :  { %1620 = vmatpush2.bf16.msra.mxu0 %v2595_v34 }
 0x1f2   :  { %1621 = vmatprep.subr.bf16.mxu0 %v2603_v14  ;;  %v2649_v14 = vld [vmem:[%s3459_s11] sm:$0xff]  }
 0x1f5   :  { %1622 = vmatpush2.bf16.msra.mxu0 %v2601_v16  ;;  %v1253_v16 = vld [vmem:[%s3461_s10] sm:$0xf] }
 0x1f6   :  { %1623 = vmatprep.subr.bf16.mxu0 %v2609_v1 }
 0x1f9   :  { %1624 = vmatpush2.bf16.msra.mxu0 %v2607_v19  ;;  %v1270_v19 = vrot.slane %v1253_v16, %v95_v39 }
 0x1fa   :  { %1625 = vmatprep.subr.bf16.mxu0 %v2615_v21  ;;  %v1266_v21 = vrot.slane %v1253_v16, %v91_v41 }
 0x1fd   :  { %1626 = vmatpush2.bf16.msra.mxu0 %v2613_v23 }
 0x1fe   :  { %2293 = vmatprep.subr.bf16.mxu0 %v2619_v25 }
 0x280   :  { %v2287_v35 = vpop.f32.mrf.mxu0 }
 0x282   :  { %v2288_v36 = vpop.f32.mrf.mxu0 }
 0x283   :  { %v2289_v42 = vadd.f32 %v2288_v36, %v2287_v35 }
 0x284   :  { %v2290_v44 = vpop.f32.mrf.mxu0 }
 0x285   :  { %v1023_v46 = vadd.f32 %v2289_v42, %v2141_v43 }
 0x286   :  { %v2291_v45 = vpop.f32.mrf.mxu0 }
 0x287   :  { %v2292_v47 = vadd.f32 %v2291_v45, %v2290_v44  ;;  %v1029_v49 = vmax.f32 %v1023_v46, 0.0 }
 0x289   :  { %v1026_v48 = vadd.f32 %v2292_v47, %v2141_v43 }
 0x28b   :  { %v1030_v50 = vmax.f32 %v1026_v48, 0.0  ;;  %v2621_v48 = vld [vmem:[%s3459_s11 + $0x38] sm:$0xff]  }
 0x28d   :  { %v1031_v52 = vpack.c.bf16 %v1030_v50, %v1029_v49  ;;  %v2622_v49 = vld [vmem:[%s3459_s11 + $0xb8] sm:$0xff]  }
 0x28f   :  { %1173 = vmatmul.mubr.bf16.vlgmr.msra.gmra.mxu1 %v1031_v52  ;;  %v2624_v52 = vld [vmem:[%s3459_s11 + $0xf0] sm:$0xff]  }
 0x290   :  { %1639 = vmatpush1.bf16.msra.mxu1 %v2526_v51  ;;  %v2623_v51 = vld [vmem:[%s3459_s11 + $0x70] sm:$0xff]  }
 0x291   :  { %1640 = vmatprep.subr.bf16.mxu1 %v2534_v53  ;;  %v2625_v53 = vld [vmem:[%s3459_s11 + $0x30] sm:$0xff]  }
 0x294   :  { %1641 = vmatpush1.bf16.msra.mxu1 %v2532_v54  ;;  %v2626_v54 = vld [vmem:[%s3459_s11 + $0xb0] sm:$0xff]  }
 0x295   :  { %1642 = vmatprep.subr.bf16.mxu1 %v2540_v55  ;;  %v2627_v55 = vld [vmem:[%s3459_s11 + $0x68] sm:$0xff]  }
 0x298   :  { %1643 = vmatpush1.bf16.msra.mxu1 %v2538_v56  ;;  %v2628_v56 = vld [vmem:[%s3459_s11 + $0xe8] sm:$0xff]  }
 0x299   :  { %1644 = vmatprep.subr.bf16.mxu1 %v2546_v57  ;;  %v2629_v57 = vld [vmem:[%s3459_s11 + $0x28] sm:$0xff]  }
 0x29c   :  { %1645 = vmatpush1.bf16.msra.mxu1 %v2544_v58  ;;  %v2630_v58 = vld [vmem:[%s3459_s11 + $0xa8] sm:$0xff]  }
 0x29d   :  { %1646 = vmatprep.subr.bf16.mxu1 %v2552_v59  ;;  %v2631_v59 = vld [vmem:[%s3459_s11 + $0x60] sm:$0xff]  }
 0x2a0   :  { %1647 = vmatpush1.bf16.msra.mxu1 %v2550_v60  ;;  %v2632_v60 = vld [vmem:[%s3459_s11 + $0xe0] sm:$0xff]  }
 0x2a1   :  { %1648 = vmatprep.subr.bf16.mxu1 %v2558_v61  ;;  %v2633_v61 = vld [vmem:[%s3459_s11 + $0x20] sm:$0xff]  }
 0x2a4   :  { %1649 = vmatpush1.bf16.msra.mxu1 %v2556_v62  ;;  %v2634_v62 = vld [vmem:[%s3459_s11 + $0xa0] sm:$0xff]  }
 0x2a5   :  { %1650 = vmatprep.subr.bf16.mxu1 %v2564_v63  ;;  %v2635_v63 = vld [vmem:[%s3459_s11 + $0x58] sm:$0xff]  }
 0x2a8   :  { %1651 = vmatpush1.bf16.msra.mxu1 %v2562_v0  ;;  %v2636_v0 = vld [vmem:[%s3459_s11 + $0xd8] sm:$0xff]  }
 0x2a9   :  { %1652 = vmatprep.subr.bf16.mxu1 %v2570_v2  ;;  %v2637_v2 = vld [vmem:[%s3459_s11 + $0x18] sm:$0xff]  }
 0x2ac   :  { %1653 = vmatpush1.bf16.msra.mxu1 %v2568_v3  ;;  %v2638_v3 = vld [vmem:[%s3459_s11 + $0x98] sm:$0xff]  }
 0x2ad   :  { %1654 = vmatprep.subr.bf16.mxu1 %v2576_v4  ;;  %v2639_v4 = vld [vmem:[%s3459_s11 + $0x50] sm:$0xff]  }
 0x2b0   :  { %1655 = vmatpush2.bf16.msra.mxu1 %v2574_v5  ;;  %v2640_v5 = vld [vmem:[%s3459_s11 + $0xd0] sm:$0xff]  }
 0x2b1   :  { %1656 = vmatprep.subr.bf16.mxu1 %v2582_v6  ;;  %v2641_v6 = vld [vmem:[%s3459_s11 + $0x10] sm:$0xff]  }
 0x2b4   :  { %1657 = vmatpush2.bf16.msra.mxu1 %v2580_v7  ;;  %v2642_v7 = vld [vmem:[%s3459_s11 + $0x90] sm:$0xff]  }
 0x2b5   :  { %1658 = vmatprep.subr.bf16.mxu1 %v2588_v8  ;;  %v2643_v8 = vld [vmem:[%s3459_s11 + $0x48] sm:$0xff]  }
 0x2b8   :  { %1659 = vmatpush2.bf16.msra.mxu1 %v2586_v9  ;;  %v2644_v9 = vld [vmem:[%s3459_s11 + $0xc8] sm:$0xff]  }
 0x2b9   :  { %1660 = vmatprep.subr.bf16.mxu1 %v2594_v10  ;;  %v2645_v10 = vld [vmem:[%s3459_s11 + $0x8] sm:$0xff]  }
 0x2bc   :  { %1661 = vmatpush2.bf16.msra.mxu1 %v2592_v11  ;;  %v2646_v11 = vld [vmem:[%s3459_s11 + $0x88] sm:$0xff]  }
 0x2bd   :  { %1662 = vmatprep.subr.bf16.mxu1 %v2600_v12  ;;  %v2647_v12 = vld [vmem:[%s3459_s11 + $0x40] sm:$0xff]  }
 0x2c0   :  { %1663 = vmatpush2.bf16.msra.mxu1 %v2598_v13  ;;  %v2648_v13 = vld [vmem:[%s3459_s11 + $0xc0] sm:$0xff]  }
 0x2c1   :  { %1664 = vmatprep.subr.bf16.mxu1 %v2606_v15  ;;  %v2650_v15 = vld [vmem:[%s3459_s11 + $0x80] sm:$0xff]  }
 0x2c4   :  { %1665 = vmatpush2.bf16.msra.mxu1 %v2604_v17 }
 0x2c5   :  { %1666 = vmatprep.subr.bf16.mxu1 %v2612_v18  ;;  %v1262_v18 = vrot.slane %v1253_v16, %v3021_v38 }
 0x2c8   :  { %1667 = vmatpush2.bf16.msra.mxu1 %v2610_v20  ;;  %v1258_v20 = vrot.slane %v1253_v16, %v3025_v40 }
 0x2c9   :  { %1668 = vmatprep.subr.bf16.mxu1 %v2618_v22 }
 0x2cc   :  { %1669 = vmatpush2.bf16.msra.mxu1 %v2616_v24 }
 0x2cd   :  { %2315 = vmatprep.subr.bf16.mxu1 %v2620_v26 }
 0x34f   :  { %v1174_v28 = vpop.f32.mrf.mxu1 }
 0x350   :  { %v1175_v35 = vadd.f32 %v1174_v28, %v1053_v30 }
 0x351   :  { %v1176_v31 = vpop.f32.mrf.mxu1 }
 0x352   :  { %v1177_v33 = vadd.f32 %v1176_v31, %v1057_v29  ;;  %v1183_v46 = vmax.f32 %v1175_v35, 0.0 }
 0x353   :  { %v1178_v32 = vpop.f32.mrf.mxu1 }
 0x354   :  { %v1179_v34 = vadd.f32 %v1178_v32, %v1053_v30  ;;  %v1184_v44 = vmax.f32 %v1177_v33, 0.0 }
 0x355   :  { %v1180_v36 = vpop.f32.mrf.mxu1 }
 0x356   :  { %v1181_v42 = vadd.f32 %v1180_v36, %v1057_v29  ;;  %v1185_v43 = vmax.f32 %v1179_v34, 0.0 }
 0x358   :  { %v1186_v45 = vmax.f32 %v1181_v42, 0.0  ;;  %v1187_v50 = vpack.c.bf16 %v1185_v43, %v1183_v46 }
 0x35a   :  { %v1188_v47 = vpack.c.bf16 %v1186_v45, %v1184_v44 }
 0x35c   :  { %1627 = vmatprep.mubr.bf16.mxu0 %v1188_v47  ;;  %1670 = vmatprep.mubr.bf16.mxu1 %v1188_v47 }
 0x35d   :  { %1628 = vmatmul.mubr.bf16.vlgmr.msra.gmra.mxu0 %v1187_v50  ;;  %1671 = vmatmul.mubr.bf16.vlgmr.msra.gmra.mxu1 %v1187_v50  ;;  %v2238_v50 = vld [vmem:[%s3462_s12] ss:$0 sm:$0xff] }
 0x35e   :  { %2294 = vmatpush3.bf16.msra.mxu0 %v2621_v48  ;;  %2316 = vmatpush3.bf16.msra.mxu1 %v2622_v49 }
 0x35f   :  { %2295 = vmatprep.subr.bf16.mxu0 %v2623_v51  ;;  %2317 = vmatprep.subr.bf16.mxu1 %v2624_v52 }
 0x362   :  { %2296 = vmatpush3.bf16.msra.mxu0 %v2625_v53  ;;  %2318 = vmatpush3.bf16.msra.mxu1 %v2626_v54 }
 0x363   :  { %2297 = vmatprep.subr.bf16.mxu0 %v2627_v55  ;;  %2319 = vmatprep.subr.bf16.mxu1 %v2628_v56 }
 0x366   :  { %2298 = vmatpush3.bf16.msra.mxu0 %v2629_v57  ;;  %2320 = vmatpush3.bf16.msra.mxu1 %v2630_v58 }
 0x367   :  { %2299 = vmatprep.subr.bf16.mxu0 %v2631_v59  ;;  %2321 = vmatprep.subr.bf16.mxu1 %v2632_v60 }
 0x36a   :  { %2300 = vmatpush3.bf16.msra.mxu0 %v2633_v61  ;;  %2322 = vmatpush3.bf16.msra.mxu1 %v2634_v62 }
 0x36b   :  { %2301 = vmatprep.subr.bf16.mxu0 %v2635_v63  ;;  %2323 = vmatprep.subr.bf16.mxu1 %v2636_v0 }
 0x36e   :  { %2302 = vmatpush3.bf16.msra.mxu0 %v2637_v2  ;;  %2324 = vmatpush3.bf16.msra.mxu1 %v2638_v3 }
 0x36f   :  { %2303 = vmatprep.subr.bf16.mxu0 %v2639_v4  ;;  %2325 = vmatprep.subr.bf16.mxu1 %v2640_v5 }
 0x372   :  { %2304 = vmatpush3.bf16.msra.mxu0 %v2641_v6  ;;  %2326 = vmatpush3.bf16.msra.mxu1 %v2642_v7 }
 0x373   :  { %2305 = vmatprep.subr.bf16.mxu0 %v2643_v8  ;;  %2327 = vmatprep.subr.bf16.mxu1 %v2644_v9 }
 0x376   :  { %2306 = vmatpush3.bf16.msra.mxu0 %v2645_v10  ;;  %2328 = vmatpush3.bf16.msra.mxu1 %v2646_v11 }
 0x377   :  { %2307 = vmatprep.subr.bf16.mxu0 %v2647_v12  ;;  %2329 = vmatprep.subr.bf16.mxu1 %v2648_v13 }
 0x37a   :  { %2308 = vmatpush3.bf16.msra.mxu0 %v2649_v14  ;;  %2330 = vmatpush3.bf16.msra.mxu1 %v2650_v15 }
 0x41d   :  { %v1629_v17 = vpop.f32.mrf.mxu0  ;;  %v1672_v1 = vpop.f32.mrf.mxu1 }
 0x41e   :  { %v1630_v30 = vadd.f32 %v1629_v17, %v1258_v20  ;;  %v1673_v31 = vadd.f32 %v1672_v1, %v1266_v21 }
 0x41f   :  { %v1631_v22 = vpop.f32.mrf.mxu0  ;;  %v1674_v23 = vpop.f32.mrf.mxu1 }
 0x420   :  { %v1632_v26 = vadd.f32 %v1631_v22, %v1262_v18  ;;  %v1675_v27 = vadd.f32 %v1674_v23, %v1270_v19  ;;  %v1681_v42 = vmax.f32 %v1630_v30, 0.0  ;;  %v1683_v43 = vmax.f32 %v1673_v31, 0.0 }
 0x421   :  { %v1633_v24 = vpop.f32.mrf.mxu0  ;;  %v1676_v25 = vpop.f32.mrf.mxu1 }
 0x422   :  { %v1634_v28 = vadd.f32 %v1633_v24, %v1258_v20  ;;  %v1677_v29 = vadd.f32 %v1676_v25, %v1266_v21  ;;  %v1682_v40 = vmax.f32 %v1632_v26, 0.0  ;;  %v1684_v36 = vmax.f32 %v1675_v27, 0.0 }
 0x423   :  { %v1635_v32 = vpop.f32.mrf.mxu0  ;;  %v1678_v38 = vpop.f32.mrf.mxu1 }
 0x424   :  { %v1636_v33 = vadd.f32 %v1635_v32, %v1262_v18  ;;  %v1679_v34 = vadd.f32 %v1678_v38, %v1270_v19  ;;  %v1685_v39 = vmax.f32 %v1634_v28, 0.0  ;;  %v1687_v35 = vmax.f32 %v1677_v29, 0.0 }
 0x426   :  { %v1686_v37 = vmax.f32 %v1636_v33, 0.0  ;;  %v1688_v41 = vmax.f32 %v1679_v34, 0.0  ;;  %v1689_v46 = vpack.c.bf16 %v1685_v39, %v1681_v42  ;;  %v1691_v47 = vpack.c.bf16 %v1687_v35, %v1683_v43 }
 0x428   :  { %v1690_v44 = vpack.c.bf16 %v1686_v37, %v1682_v40  ;;  %v1692_v45 = vpack.c.bf16 %v1688_v41, %v1684_v36 }
 0x42a   :  { %1988 = vmatprep.mubr.bf16.mxu0 %v1690_v44  ;;  %2029 = vmatprep.mubr.bf16.mxu1 %v1692_v45 }
 0x42b   :  { %1989 = vmatmul.mubr.bf16.vlgmr.msra.gmra.mxu0 %v1689_v46  ;;  %2030 = vmatmul.mubr.bf16.vlgmr.msra.gmra.mxu1 %v1691_v47 }
 0x4eb   :  { %v2309_v48 = vpop.f32.mrf.mxu0  ;;  %v2331_v49 = vpop.f32.mrf.mxu1 }
 0x4ed   :  { %v2310_v51 = vpop.f32.mrf.mxu0  ;;  %v2332_v52 = vpop.f32.mrf.mxu1 }
 0x4ee   :  { %v2311_v53 = vadd.f32 %v2310_v51, %v2309_v48  ;;  %v2333_v57 = vadd.f32 %v2332_v52, %v2331_v49 }
 0x4ef   :  { %v2312_v54 = vpop.f32.mrf.mxu0  ;;  %v2334_v55 = vpop.f32.mrf.mxu1 }
 0x4f0   :  { %v1991_v56 = vadd.f32 %v2311_v53, %v2238_v50 }
 0x4f1   :  { %v2313_v58 = vpop.f32.mrf.mxu0  ;;  %v2335_v59 = vpop.f32.mrf.mxu1 }
 0x4f2   :  { %v2032_v60 = vadd.f32 %v2333_v57, %v1991_v56  ;;  %v2314_v61 = vadd.f32 %v2313_v58, %v2312_v54  ;;  %v2336_v63 = vadd.f32 %v2335_v59, %v2334_v55 }
 0x4f4   :  { %2038 = vst [vmem:[%s3463_s13] sm:$0xff] %v2032_v60  ;;  %v1994_v62 = vadd.f32 %v2314_v61, %v2238_v50 }
 0x4f6   :  { %v2035_v0 = vadd.f32 %v2336_v63, %v1994_v62 }
 0x4f8   :  { %2039 = vst [vmem:[%s3463_s13 + $0x8] sm:$0xff] %v2035_v0 }

</bundles_post_ra>
